<compile_context>
chip_gen: v7x
topology: tpu7x:2x2x1
jax: 0.10.0
libtpu: 0.0.40
codegen_flags: <defaults>
</compile_context>

<pallas_src>
import functools

import jax
import jax.numpy as jnp
from jax.experimental import pallas as pl
from jax.experimental.pallas import tpu as pltpu

BN_EPS = 1e-5

# Row indices inside the fused (5, 2*OUT) parameter slab.
ROW_BIAS, ROW_FLOOR, ROW_GAMMA, ROW_BETA, ROW_INVMASK = range(5)


def residual_block_kernel(x_ref, w_ref, rows_ref, o_ref, *, out_features):
    x = x_ref[...]

    # One fused MXU matmul: lanes [0, OUT) = main branch, [OUT, 2*OUT) = identity.
    fused = jnp.dot(x, w_ref[...], preferred_element_type=jnp.float32)

    bias = rows_ref[ROW_BIAS:ROW_BIAS + 1, :]
    relu_floor = rows_ref[ROW_FLOOR:ROW_FLOOR + 1, :]      # 0 on main, -FLT_MAX on identity
    gamma_pad = rows_ref[ROW_GAMMA:ROW_GAMMA + 1, :]       # gamma on main, 0 on identity
    beta_pad = rows_ref[ROW_BETA:ROW_BETA + 1, :]          # beta  on main, 0 on identity
    inv_mask = rows_ref[ROW_INVMASK:ROW_INVMASK + 1, :]    # 0 on main, 1 on identity

    # Linear bias + ReLU on the main half only: max against a per-lane floor
    # (identity lanes get a huge negative floor -> pass through untouched).
    act = jnp.maximum(fused + bias, relu_floor)

    # BatchNorm1d, training mode: biased batch stats over the batch axis,
    # folded into per-row (1, 2*OUT) affine terms.  Identity lanes end up with
    # scale=1, shift=0 because gamma_pad/beta_pad are zero there.
    mean = jnp.mean(act, axis=0, keepdims=True)
    var = jnp.mean(act * act, axis=0, keepdims=True) - mean * mean
    g_rs = gamma_pad * jax.lax.rsqrt(var + BN_EPS)          # EUP rsqrt, (1, 2*OUT)
    scale = g_rs + inv_mask
    shift = beta_pad - mean * g_rs
    merged = act * scale + shift                            # only full-tile mul+add

    # Dropout(p=0.0) is the identity -> nothing to do.

    # Residual add: bring the identity half onto the main half via an XLU
    # half-rotation of the 2*OUT-wide lane axis (direction-agnostic).
    rolled = pltpu.roll(merged, shift=out_features, axis=1)
    result = jnp.maximum(merged + rolled, 0.0)

    # Write the (B, OUT) result directly (masked sub-128-lane store is fine here).
    o_ref[...] = result[:, :out_features].astype(o_ref.dtype)


def fuse_params(w1, b1, w2, b2, gamma, beta):
    """Run ONCE at init: pre-transpose + concatenate parameters into the
    MXU / lane-friendly layout the kernel consumes (no per-call transposes,
    casts or concatenations).

    w1, w2: (OUT, IN) PyTorch layout; b1, b2, gamma, beta: (OUT,).
    Returns:
      w_fused: (IN, 2*OUT)  -- [main | identity] weights, MXU layout.
      rows:    (5, 2*OUT)   -- bias / relu_floor / gamma / beta / inv_mask.
    """
    zeros = jnp.zeros_like(gamma)
    ones = jnp.ones_like(gamma)
    neg_floor = jnp.full_like(gamma, jnp.finfo(jnp.float32).min)

    w_fused = jnp.concatenate([w1.T, w2.T], axis=1)          # (IN, 2*OUT)
    rows = jnp.stack([
        jnp.concatenate([b1, b2]),                           # ROW_BIAS
        jnp.concatenate([zeros, neg_floor]),                 # ROW_FLOOR
        jnp.concatenate([gamma, zeros]),                     # ROW_GAMMA
        jnp.concatenate([beta, zeros]),                      # ROW_BETA
        jnp.concatenate([zeros, ones]),                      # ROW_INVMASK
    ]).astype(jnp.float32)                                   # (5, 2*OUT)
    return w_fused, rows


def residual_block(x, w_fused, rows):
    """x: (B, IN) f32; fused params from fuse_params().  Returns (B, OUT) f32."""
    batch = x.shape[0]
    two_out = w_fused.shape[1]
    out_features = two_out // 2

    vmem = pl.BlockSpec(memory_space=pltpu.MemorySpace.VMEM)
    return pl.pallas_call(
        functools.partial(residual_block_kernel, out_features=out_features),
        out_shape=jax.ShapeDtypeStruct((batch, out_features), jnp.float32),
        in_specs=[vmem, vmem, vmem],
        out_specs=vmem,
    )(x, w_fused, rows)


def residual_block_ref(x, w1, b1, w2, b2, gamma, beta):
    """Pure-JAX reference mirroring the PyTorch training-mode forward."""
    identity = x @ w2.T + b2
    out = x @ w1.T + b1
    out = jnp.maximum(out, 0.0)
    mean = jnp.mean(out, axis=0, keepdims=True)
    var = jnp.mean((out - mean) ** 2, axis=0, keepdims=True)
    out = (out - mean) / jnp.sqrt(var + BN_EPS) * gamma + beta
    out = out + identity
    return jnp.maximum(out, 0.0)


def init_params(key, input_size, output_size):
    """PyTorch nn.Linear default init U(-1/sqrt(in), 1/sqrt(in)).  BatchNorm
    gamma/beta randomized (instead of ones/zeros) purely to exercise the
    affine path in the correctness check."""
    k1, k2, k3, k4, k5, k6 = jax.random.split(key, 6)
    bound = 1.0 / jnp.sqrt(input_size)
    w1 = jax.random.uniform(k1, (output_size, input_size), jnp.float32, -bound, bound)
    b1 = jax.random.uniform(k2, (output_size,), jnp.float32, -bound, bound)
    w2 = jax.random.uniform(k3, (output_size, input_size), jnp.float32, -bound, bound)
    b2 = jax.random.uniform(k4, (output_size,), jnp.float32, -bound, bound)
    gamma = 1.0 + 0.1 * jax.random.normal(k5, (output_size,), jnp.float32)
    beta = 0.1 * jax.random.normal(k6, (output_size,), jnp.float32)
    return w1, b1, w2, b2, gamma, beta


if __name__ == "__main__":
    B, IN, OUT = 8, 32, 64   # input_size != output_size -> adjust_dims is a Linear
    key = jax.random.PRNGKey(0)
    kx, kp = jax.random.split(key)
    x = jax.random.normal(kx, (B, IN), jnp.float32)
    w1, b1, w2, b2, gamma, beta = init_params(kp, IN, OUT)

    # One-time parameter fusion (canonical storage layout for the kernel).
    w_fused, rows = fuse_params(w1, b1, w2, b2, gamma, beta)

    out = residual_block(x, w_fused, rows)
    out = jax.block_until_ready(out)

    ref = residual_block_ref(x, w1, b1, w2, b2, gamma, beta)
    assert out.shape == (B, OUT)
    assert jnp.allclose(out, ref, atol=1e-4, rtol=1e-4), "mismatch vs reference"
    print("KERNEL_OK")
</pallas_src>

<mosaic_0001>
module attributes {stable_mosaic.version = 11 : i64} {
  func.func @residual_block_kernel(%arg0: memref<8x32xf32, #tpu.memory_space<vmem>>, %arg1: memref<32x128xf32, #tpu.memory_space<vmem>>, %arg2: memref<5x128xf32, #tpu.memory_space<vmem>>, %arg3: memref<8x64xf32, #tpu.memory_space<vmem>>) attributes {dimension_semantics = [], scalar_prefetch = 0 : i64, scratch_operands = 0 : i64, tpu.core_type = #tpu.core_type<tc>} {
    %c0 = arith.constant 0 : index
    %c0_0 = arith.constant 0 : index
    %0 = vector.load %arg0[%c0, %c0_0] : memref<8x32xf32, #tpu.memory_space<vmem>>, vector<8x32xf32>
    %c0_1 = arith.constant 0 : index
    %c0_2 = arith.constant 0 : index
    %1 = vector.load %arg1[%c0_1, %c0_2] : memref<32x128xf32, #tpu.memory_space<vmem>>, vector<32x128xf32>
    %cst = arith.constant dense<0.000000e+00> : vector<8x128xf32>
    %2 = tpu.matmul %0, %1, %cst {dimension_numbers = #tpu.dot_dimension_numbers<[1], [0], [0], [1], [0, 0, 1, 1], [], []>} : vector<8x32xf32>, vector<32x128xf32>, vector<8x128xf32> -> vector<8x128xf32>
    %c0_3 = arith.constant 0 : index
    %c0_4 = arith.constant 0 : index
    %3 = vector.load %arg2[%c0_3, %c0_4] : memref<5x128xf32, #tpu.memory_space<vmem>>, vector<1x128xf32>
    %c1 = arith.constant 1 : index
    %c0_5 = arith.constant 0 : index
    %4 = vector.load %arg2[%c1, %c0_5] : memref<5x128xf32, #tpu.memory_space<vmem>>, vector<1x128xf32>
    %c2 = arith.constant 2 : index
    %c0_6 = arith.constant 0 : index
    %5 = vector.load %arg2[%c2, %c0_6] : memref<5x128xf32, #tpu.memory_space<vmem>>, vector<1x128xf32>
    %c3 = arith.constant 3 : index
    %c0_7 = arith.constant 0 : index
    %6 = vector.load %arg2[%c3, %c0_7] : memref<5x128xf32, #tpu.memory_space<vmem>>, vector<1x128xf32>
    %c4 = arith.constant 4 : index
    %c0_8 = arith.constant 0 : index
    %7 = vector.load %arg2[%c4, %c0_8] : memref<5x128xf32, #tpu.memory_space<vmem>>, vector<1x128xf32>
    %8 = vector.broadcast %3 : vector<1x128xf32> to vector<8x128xf32>
    %9 = arith.addf %2, %8 : vector<8x128xf32>
    %10 = vector.broadcast %4 : vector<1x128xf32> to vector<8x128xf32>
    %11 = arith.maximumf %9, %10 : vector<8x128xf32>
    %cst_9 = arith.constant dense<0.000000e+00> : vector<128xf32>
    %12 = vector.multi_reduction <add>, %11, %cst_9 [0] : vector<8x128xf32> to vector<128xf32>
    %13 = vector.shape_cast %12 : vector<128xf32> to vector<1x128xf32>
    %cst_10 = arith.constant 8.000000e+00 : f32
    %14 = vector.broadcast %cst_10 : f32 to vector<1x128xf32>
    %15 = arith.divf %13, %14 : vector<1x128xf32>
    %16 = arith.mulf %11, %11 : vector<8x128xf32>
    %cst_11 = arith.constant dense<0.000000e+00> : vector<128xf32>
    %17 = vector.multi_reduction <add>, %16, %cst_11 [0] : vector<8x128xf32> to vector<128xf32>
    %18 = vector.shape_cast %17 : vector<128xf32> to vector<1x128xf32>
    %cst_12 = arith.constant 8.000000e+00 : f32
    %19 = vector.broadcast %cst_12 : f32 to vector<1x128xf32>
    %20 = arith.divf %18, %19 : vector<1x128xf32>
    %21 = arith.mulf %15, %15 : vector<1x128xf32>
    %22 = arith.subf %20, %21 : vector<1x128xf32>
    %cst_13 = arith.constant 9.99999974E-6 : f32
    %23 = vector.broadcast %cst_13 : f32 to vector<1x128xf32>
    %24 = arith.addf %22, %23 : vector<1x128xf32>
    %25 = math.rsqrt %24 : vector<1x128xf32>
    %26 = arith.mulf %5, %25 : vector<1x128xf32>
    %27 = arith.addf %26, %7 : vector<1x128xf32>
    %28 = arith.mulf %15, %26 : vector<1x128xf32>
    %29 = arith.subf %6, %28 : vector<1x128xf32>
    %30 = vector.broadcast %27 : vector<1x128xf32> to vector<8x128xf32>
    %31 = arith.mulf %11, %30 : vector<8x128xf32>
    %32 = vector.broadcast %29 : vector<1x128xf32> to vector<8x128xf32>
    %33 = arith.addf %31, %32 : vector<8x128xf32>
    %c64_i32 = arith.constant 64 : i32
    %34 = tpu.dynamic_rotate %33 by %c64_i32 dim 1 : vector<8x128xf32>, i32 -> vector<8x128xf32>
    %35 = arith.addf %33, %34 : vector<8x128xf32>
    %cst_14 = arith.constant 0.000000e+00 : f32
    %36 = vector.broadcast %cst_14 : f32 to vector<8x128xf32>
    %37 = arith.maximumf %35, %36 : vector<8x128xf32>
    %38 = vector.extract_strided_slice %37 {offsets = [0, 0], sizes = [8, 64], strides = [1, 1]} : vector<8x128xf32> to vector<8x64xf32>
    %c0_15 = arith.constant 0 : index
    %c0_16 = arith.constant 0 : index
    %39 = vector.load %arg3[%c0_15, %c0_16] : memref<8x64xf32, #tpu.memory_space<vmem>>, vector<8x64xf32>
    tpu.vector_store %arg3[%c0_15, %c0_16], %38 {strides = array<i32>} : memref<8x64xf32, #tpu.memory_space<vmem>>, vector<8x64xf32>,
    return
  }
}

</mosaic_0001>

<bundles_post_ra>
// kernel: tpu_custom_call.1
= control target key start
LH: loop header
LB: loop body
LE: loop exit
PB: predicated region body
PF: predicated region fallthrough
CT: control target
= control target key end

     0   :  { %8 = vsyncpa [#allocation3], 0  ;;  %s410_s0 = inlined_call_operand.hbm [shape: f32[8,32], index: 0, kind: input, shape index: {}]   ;;  %s411_s1 = inlined_call_operand.hbm [shape: f32[32,128], index: 1, kind: input, shape index: {}]   ;;  %s412_s2 = inlined_call_operand.hbm [shape: f32[5,128], index: 2, kind: input, shape index: {}]   ;;  %s413_s3 = inlined_call_operand.hbm [shape: f32[8,64], index: 3, kind: output, shape index: {}]  }
   0x1   :  { %9 = vsyncpa [#allocation6], 0 }
   0x2   :  { %10 = vsyncpa [#allocation4], 0  ;;  %s332_s12 = smov [#allocation5]   ;;  %s238_s16 = scalar_lea.hbm %s411_s1, 512 }
   0x3   :  { %s26_s13 = sshll.u32 %s332_s12, 4  ;;  %p239_p0 = scmp.ne.s32.totalorder %s411_s1, %s238_s16  ;;  %s27_s13 = int_to_ptr.vmem [resolvable:$true] %s26_s13 }
   0x4   :  { %p242_p1 = scmp.lt.u32.totalorder %s238_s16, %s411_s1 }
   0x6   :  { %p244_p2 = pnand %p242_p1, %p239_p0 }
   0x8   :  { %247 = shalt.err (!%p244_p2)
}
   0x9   :  { %s248_s21 = scalar_lea.vmem %s27_s13, 512  ;;  %p253_p4 = scmp.lt.s32.totalorder %s27_s13, %s27_s13 }
   0xa   :  { %p249_p3 = scmp.ne.s32.totalorder %s27_s13, %s248_s21  ;;  %p254_p5 = scmp.lt.s32.totalorder %s248_s21, %s248_s21 }
   0xc   :  { %p255_p6 = por %p254_p5, %p253_p4 }
   0xe   :  { %p256_p7 = pnand %p255_p6, %p249_p3 }
  0x10   :  { %259 = shalt.err (!%p256_p7)
}
  0x11   :  { %s333_s22 = smov 128   ;;  %s334_s23 = smov 8  }
  0x12   :  { %32 = dma.hbm_to_vmem [thread:$0]  %s411_s1, 512, %s27_s13, [#allocation6], %s333_s22, %s333_s22, %s334_s23  }
  0x13   :  { %s335_s26 = smov [#allocation2]   ;;  %s336_s28 = smov [#allocation7]  }
  0x14   :  { %s17_s27 = sshll.u32 %s335_s26, 4  ;;  %s39_s29 = sshll.u32 %s336_s28, 4  ;;  %s18_s27 = int_to_ptr.vmem [resolvable:$true] %s17_s27  ;;  %s40_s29 = int_to_ptr.vmem [resolvable:$true] %s39_s29 }
  0x15   :  { %s260_s5 = scalar_lea.hbm %s410_s0, 128 }
  0x16   :  { %p261_p8 = scmp.ne.s32.totalorder %s410_s0, %s260_s5  ;;  %p264_p9 = scmp.lt.u32.totalorder %s260_s5, %s410_s0 }
  0x18   :  { %p266_p10 = pnand %p264_p9, %p261_p8 }
  0x1a   :  { %269 = shalt.err (!%p266_p10)
}
  0x1b   :  { %s270_s1 = scalar_lea.vmem %s18_s27, 128  ;;  %p275_p12 = scmp.lt.s32.totalorder %s18_s27, %s18_s27 }
  0x1c   :  { %p271_p11 = scmp.ne.s32.totalorder %s18_s27, %s270_s1  ;;  %p276_p13 = scmp.lt.s32.totalorder %s270_s1, %s270_s1 }
  0x1e   :  { %p277_p0 = por %p276_p13, %p275_p12 }
  0x20   :  { %p278_p1 = pnand %p277_p0, %p271_p11 }
  0x22   :  { %281 = shalt.err (!%p278_p1)
}
  0x23   :  { %20 = dma.hbm_to_vmem [thread:$0]  %s410_s0, 128, %s18_s27, [#allocation3]  }
  0x24   :  { %s282_s14 = scalar_lea.hbm %s412_s2, 128 }
  0x25   :  { %p283_p2 = scmp.ne.s32.totalorder %s412_s2, %s282_s14  ;;  %p286_p3 = scmp.lt.u32.totalorder %s282_s14, %s412_s2 }
  0x27   :  { %p288_p4 = pnand %p286_p3, %p283_p2 }
  0x29   :  { %291 = shalt.err (!%p288_p4)
}
  0x2a   :  { %s292_s19 = scalar_lea.vmem %s40_s29, 128  ;;  %p297_p6 = scmp.lt.s32.totalorder %s40_s29, %s40_s29 }
  0x2b   :  { %p293_p5 = scmp.ne.s32.totalorder %s40_s29, %s292_s19  ;;  %p298_p7 = scmp.lt.s32.totalorder %s292_s19, %s292_s19 }
  0x2d   :  { %p299_p8 = por %p298_p7, %p297_p6 }
  0x2f   :  { %p300_p9 = pnand %p299_p8, %p293_p5 }
  0x31   :  { %303 = shalt.err (!%p300_p9)
}
  0x32   :  { %42 = dma.hbm_to_vmem [thread:$0]  %s412_s2, 128, %s40_s29, [#allocation6]  }
  0x33   :  { %326 = dma.done.wait [#allocation3], 128  }
  0x34   :  { %327 = vsyncadd [#allocation3], 4294967168 }
  0x35   :  { %328 = dma.done.wait [#allocation6], 640  }
  0x36   :  { %329 = vsyncadd [#allocation6], 4294966656  ;;  %v337_v0 = vmov 0.0|0.0   ;;  %vm338_vm0 = vmmov 0   ;;  %v339_v1 = vmov 0.0   ;;  %v53_v2 = vld [vmem:[#allocation5] sm:$0xff]  ;;  %v169_v33 = vlaneseq }
  0x37   :  { %220 = vmatprep.subr.bf16.mxu0 %v337_v0  ;;  %217 = vmatprep.mubr.msk.f32.mxu0 %vm338_vm0, %v339_v1  ;;  %v54_v3 = vld [vmem:[#allocation5 + $0x8] sm:$0xff]  ;;  %v55_v4 = vld [vmem:[#allocation5 + $0x10] sm:$0xff]  ;;  %v56_v6 = vld [vmem:[#allocation5 + $0x18] sm:$0xff]  ;;  %vm66_vm1 = vcmask 261120   ;;  %s340_s2 = smov 64   ;;  %s341_s21 = smov [#allocation8]  }
  0x38   :  { %v221_v5 = vpack.c.bf16 %v54_v3, %v53_v2  ;;  %v224_v7 = vpack.c.bf16 %v56_v6, %v55_v4  ;;  %v52_v8 = vld [vmem:[#allocation2] sm:$0xff]  ;;  %v201_v9 = vld [vmem:[#allocation7] ss:$0 sm:$0xff]  ;;  %v203_v10 = vld [vmem:[#allocation7 + $0x1] ss:$0 sm:$0xff]  ;;  %v170_v34 = vshrl.u32 %v169_v33, 7 }
  0x39   :  { %v59_v35 = vld [vmem:[#allocation7 + $0x2] sm:$0x1]  ;;  %v61_v37 = vld [vmem:[#allocation7 + $0x4] sm:$0x1]  ;;  %v60_v40 = vld [vmem:[#allocation7 + $0x3] sm:$0x1] }
  0x3a   :  { %222 = vmatpush3.bf16.msra.mxu0 %v221_v5  ;;  %v171_v39 = vsub.s32 0, %v170_v34  ;;  %s191_s22 = sshll.u32 %s341_s21, 4  ;;  %vm183_vm2 = vcmask 523264   ;;  %s192_s22 = int_to_ptr.vmem [resolvable:$true] %s191_s22 }
  0x3b   :  { %223 = vmatprep.subr.bf16.mxu0 %v337_v0  ;;  %s304_s23 = scalar_lea.vmem %s192_s22, 128  ;;  %p309_p11 = scmp.lt.s32.totalorder %s192_s22, %s192_s22 }
  0x3c   :  { %p305_p10 = scmp.ne.s32.totalorder %s192_s22, %s304_s23  ;;  %p310_p12 = scmp.lt.s32.totalorder %s304_s23, %s304_s23 }
  0x3e   :  { %225 = vmatpush3.bf16.msra.mxu0 %v224_v7  ;;  %p311_p13 = por %p310_p12, %p309_p11 }
  0x40   :  { %p312_p0 = pnand %p311_p13, %p305_p10 }
  0x41   :  { %218 = vmatmul.mubr.msk.f32.vlgmr.msra.gmra.mrb[0].mxu0 %vm66_vm1, %v52_v8 }
 0x114   :  { %v136_v11 = vpop.f32.mrb[0].mxu0 }
 0x115   :  { %v137_v12 = vadd.f32 %v201_v9, %v136_v11  ;;  %v219_v13 = vpop.f32.mrb[1].mxu0 }
 0x117   :  { %v144_v14 = vmax.f32 %v137_v12, %v203_v10 }
 0x119   :  { %v145_v15 = vrot.slane %v144_v14, 4  ;;  %v153_v16 = vmul.f32 %v144_v14, %v144_v14 }
 0x11b   :  { %v146_v17 = vadd.f32 %v145_v15, %v144_v14  ;;  %v154_v18 = vrot.slane %v153_v16, 4 }
 0x11d   :  { %v147_v19 = vrot.slane %v146_v17, 2  ;;  %v155_v20 = vadd.f32 %v154_v18, %v153_v16 }
 0x11f   :  { %v156_v21 = vrot.slane %v155_v20, 2  ;;  %v148_v22 = vadd.f32 %v147_v19, %v146_v17 }
 0x121   :  { %v157_v23 = vadd.f32 %v156_v21, %v155_v20  ;;  %v149_v24 = vrot.slane %v148_v22, 1 }
 0x123   :  { %v158_v25 = vrot.slane %v157_v23, 1  ;;  %v150_v26 = vadd.f32 %v149_v24, %v148_v22 }
 0x125   :  { %v152_v27 = vmul.f32 0.125, %v150_v26  ;;  %v159_v28 = vadd.f32 %v158_v25, %v157_v23 }
 0x127   :  { %v160_v29 = vmul.f32 0.125, %v159_v28  ;;  %v161_v30 = vmul.f32 %v152_v27, %v152_v27 }
 0x129   :  { %v162_v31 = vsub.f32 %v160_v29, %v161_v30 }
 0x12b   :  { %v163_v32 = vadd.f32 1e-05, %v162_v31 }
 0x12d   :  { %236 = vrsqrt.f32 %v163_v32 }
 0x137   :  { %v237_v36 = vpop.eup %236 }
 0x138   :  { %v165_v38 = vmul.f32 %v237_v36, %v59_v35 }
 0x13a   :  { %v166_v41 = vadd.f32 %v165_v38, %v61_v37  ;;  %v167_v42 = vmul.f32 %v165_v38, %v152_v27 }
 0x13c   :  { %v168_v43 = vsub.f32 %v60_v40, %v167_v42  ;;  %v172_v44 = vrot.slane %v166_v41, %v171_v39 }
 0x13e   :  { %v173_v45 = vmul.f32 %v172_v44, %v144_v14  ;;  %v177_v46 = vrot.slane %v168_v43, %v171_v39 }
 0x140   :  { %v178_v47 = vadd.f32 %v177_v46, %v173_v45 }
 0x142   :  { %179 = vrot.lane.b32.xlu0 %v178_v47, %s340_s2 }
 0x1b4   :  { %v180_v48 = vpop.permute.xlu0 %179 }
 0x1b5   :  { %v181_v49 = vadd.f32 %v180_v48, %v178_v47 }
 0x1b7   :  { %v182_v50 = vmax.f32 %v181_v49, 0.0 }
 0x1b9   :  { %184 = vst.msk [vmem:[#allocation8] sm:$0xff] %vm183_vm2, %v182_v50 }
 0x1ba   :  { %315 = shalt.err (!%p312_p0)
}
 0x1bb   :  { %s316_s26 = scalar_lea.hbm %s413_s3, 128 }
 0x1bc   :  { %p317_p1 = scmp.ne.s32.totalorder %s413_s3, %s316_s26  ;;  %p320_p2 = scmp.lt.u32.totalorder %s316_s26, %s413_s3 }
 0x1be   :  { %p322_p3 = pnand %p320_p2, %p317_p1 }
 0x1c0   :  { %325 = shalt.err (!%p322_p3)
}
 0x1c1   :  { %194 = dma.vmem_to_hbm [thread:$0]  %s192_s22, 128, %s413_s3, [#allocation4]  }
 0x1c2   :  { %330 = dma.done.wait [#allocation4], 128  }
 0x1c3   :  { %331 = vsyncadd [#allocation4], 4294967168 }
 0x1c4   :  { %198 = vsyncpa [#allocation3], 1 }
 0x1c5   :  { %199 = vsyncpa [#allocation6], 1 }
 0x1c6   :  { %200 = vsyncpa [#allocation4], 1 }

</bundles_post_ra>
